<compile_context>
chip_gen: v7x
topology: tpu7x:2x2x1
jax: 0.10.0
libtpu: 0.0.40
codegen_flags: <defaults>
</compile_context>

<pallas_src>
import functools

import jax
import jax.numpy as jnp
from jax.experimental import pallas as pl
from jax.experimental.pallas import tpu as pltpu


def _round_up(n, m):
    return ((n + m - 1) // m) * m


# --------------------------------------------------------------------------- #
# Kernel
# --------------------------------------------------------------------------- #
def _mlp_kernel(x_ref, w1_ref, b1_ref, w2_ref, b2_ref, w3_ref, b3_ref,
                o_ref, acc_ref, *, out_dim):
    """One (batch-tile, K-tile) grid step of the 3-layer MLP.

    Grid = (num_batch_tiles, num_k_tiles). Layer 1's input dimension
    (d0 = E * num_llm_layers) is reduced over the last ("arbitrary") grid axis
    into a resident f32 VMEM accumulator; layers 2/3 and the output store run
    only on the final K step.
    """
    k = pl.program_id(1)
    nk = pl.num_programs(1)
    cdt = w1_ref.dtype                      # MXU input dtype (f32 or bf16)

    @pl.when(k == 0)
    def _init():
        acc_ref[...] = jnp.zeros_like(acc_ref)

    # Layer-1 partial product for this K slice (f32 accumulation on the MXU).
    acc_ref[...] += jnp.dot(x_ref[...].astype(cdt), w1_ref[...],
                            preferred_element_type=jnp.float32)

    @pl.when(k == nk - 1)
    def _epilogue():
        # Bias + ReLU kept in f32 on the VPU (v5e has no bf16 VPU path).
        h = jnp.maximum(acc_ref[...] + b1_ref[...], 0.0)
        h = jnp.dot(h.astype(cdt), w2_ref[...],
                    preferred_element_type=jnp.float32)
        h = jnp.maximum(h + b2_ref[...], 0.0)
        out = jnp.dot(h.astype(cdt), w3_ref[...],
                      preferred_element_type=jnp.float32)
        out = out + b3_ref[...]
        # w3/b3 are lane-padded for MXU alignment only; store just the true
        # output columns (narrow block == full HBM array width, no pad traffic).
        o_ref[...] = out[:, :out_dim].astype(o_ref.dtype)


# --------------------------------------------------------------------------- #
# Tile / VMEM-budget selection
# --------------------------------------------------------------------------- #
def _vmem_budget():
    """Return (vmem_limit_bytes, tile_budget_bytes), generation-aware."""
    try:
        cap = int(pltpu.get_tpu_info().vmem_capacity_bytes)
    except Exception:
        cap = 64 << 20                       # unknown -> assume v7x-like (small)
    if cap >= (100 << 20):                   # v5e / v6e: 128 MiB per TensorCore
        return 64 << 20, 48 << 20
    return 32 << 20, 24 << 20                # v7x: 64 MiB per TensorCore


def _choose_tiles(B, d0, h1, h2, out_pad, out_dim, *,
                  x_itemsize, w_itemsize, budget):
    """Pick (batch_tile, k_tile) so resident weights + pipelined blocks fit."""
    bias_bytes = 4 * (h1 + h2 + out_pad)                  # biases stay f32
    small_w_bytes = w_itemsize * (h1 * h2 + h2 * out_pad)  # w2 + (padded) w3

    # ---- K tile for layer 1: keep (double-buffered) resident weights inside
    #      roughly half the budget.
    weight_budget = budget // 2
    max_w1_block = weight_budget // 2 - small_w_bytes - bias_bytes
    if w_itemsize * d0 * h1 <= max_w1_block or d0 % 128 != 0:
        # TODO(synk): if d0 % 128 != 0 AND w1 alone exceeds VMEM, this kernel
        # cannot K-tile cleanly (tk must be a multiple of 128 or equal d0).
        tk = d0
    else:
        cand = max(128, (max_w1_block // (w_itemsize * h1)) // 128 * 128)
        while cand > 128 and d0 % cand != 0:
            cand -= 128
        tk = cand if d0 % cand == 0 else 128

    # ---- Batch tile: amortize ~0.35us/grid-step overhead with multi-MiB x
    #      tiles, within what's left of the budget after the resident weights.
    resident_w = 2 * (w_itemsize * tk * h1 + small_w_bytes + bias_bytes)
    avail = max(budget - resident_w, budget // 4)
    per_row = (2 * tk * x_itemsize           # double-buffered x block
               + 2 * out_dim * 4             # double-buffered out block
               + 4 * h1                      # f32 layer-1 accumulator scratch
               + 4 * (h1 + h2 + out_pad))    # epilogue intermediates headroom
    target_rows = max(16, (6 << 20) // max(1, tk * x_itemsize))  # ~6 MiB x tile
    cap_rows = max(16, avail // per_row)
    tb = max(16, (min(target_rows, cap_rows) // 16) * 16)

    if tb >= B:
        # Whole batch in one resident tile (block dim == array dim is always
        # legal) -- unless the batch is big enough that two tiles let v7x's two
        # TensorCores split the "parallel" grid axis.
        if B >= 1024:
            tb = _round_up((B + 1) // 2, 16)
            if tb >= B:
                tb = B
        else:
            tb = B
    return tb, tk


# --------------------------------------------------------------------------- #
# Wrapper
# --------------------------------------------------------------------------- #
@functools.partial(jax.jit, static_argnames=("batch_tile", "k_tile"))
def stacked_layers_forward(x, params, *, batch_tile=None, k_tile=None):
    """x: (B, L, E) (or any (B, ...)). Returns (out, None) like the torch module."""
    w1, b1, w2, b2, w3, b3 = params
    B = x.shape[0]
    x2d = x.reshape(B, -1)                   # == torch .view(B, -1); keep dtype
    d0 = x2d.shape[1]
    h1 = w1.shape[1]
    h2 = w2.shape[1]
    out_dim = w3.shape[1]
    assert w1.shape[0] == d0 and w2.shape[0] == h1 and w3.shape[0] == h2

    # Lane-pad only the last layer's (tiny) weights/bias so the final MXU
    # matmul is aligned; the HBM output stays at the true out_dim width.
    out_pad = _round_up(out_dim, 128)
    if out_pad != out_dim:
        w3 = jnp.pad(w3, ((0, 0), (0, out_pad - out_dim)))
        b3 = jnp.pad(b3, ((0, 0), (0, out_pad - out_dim)))

    vmem_limit, budget = _vmem_budget()
    tb, tk = _choose_tiles(B, d0, h1, h2, out_pad, out_dim,
                           x_itemsize=x2d.dtype.itemsize,
                           w_itemsize=w1.dtype.itemsize,
                           budget=budget)
    if batch_tile is not None:
        tb = batch_tile if batch_tile < B else B
    if k_tile is not None:
        tk = k_tile
    if tb < B:
        assert tb % 8 == 0, "batch tile must be a multiple of 8"
    assert d0 % tk == 0 and (tk == d0 or tk % 128 == 0), "bad K tile"

    nb = pl.cdiv(B, tb)
    nk = d0 // tk

    # Advisory cost estimate (helps XLA overlap the custom call with producers).
    w_bytes = sum(int(a.size) * a.dtype.itemsize for a in (w1, b1, w2, b2, w3, b3))
    cost = pl.CostEstimate(
        flops=2 * B * (d0 * h1 + h1 * h2 + h2 * out_pad),
        transcendentals=0,
        bytes_accessed=B * (d0 * x2d.dtype.itemsize + out_dim * 4) + w_bytes,
    )

    def const(shape):
        # Whole-array block, constant block index -> DMA'd once, VMEM-resident.
        return pl.BlockSpec(shape, lambda i, k: (0, 0))

    out = pl.pallas_call(
        functools.partial(_mlp_kernel, out_dim=out_dim),
        out_shape=jax.ShapeDtypeStruct((B, out_dim), jnp.float32),
        grid=(nb, nk),
        in_specs=[
            pl.BlockSpec((tb, tk), lambda i, k: (i, k)),      # x (batch, K tiled)
            pl.BlockSpec((tk, h1), lambda i, k: (k, 0)),      # w1 (K tiled)
            const((1, h1)),                                   # b1
            const((h1, h2)), const((1, h2)),                  # w2, b2
            const((h2, out_pad)), const((1, out_pad)),        # w3, b3 (lane-padded)
        ],
        out_specs=pl.BlockSpec((tb, out_dim), lambda i, k: (i, 0)),
        scratch_shapes=[pltpu.VMEM((tb, h1), jnp.float32)],   # layer-1 accumulator
        compiler_params=pltpu.CompilerParams(
            dimension_semantics=("parallel", "arbitrary"),    # megacore on v7x
            vmem_limit_bytes=vmem_limit,
        ),
        cost_estimate=cost,
    )(x2d, w1, b1, w2, b2, w3, b3)

    return out, None


# --------------------------------------------------------------------------- #
# Params + pure-JAX reference
# --------------------------------------------------------------------------- #
def init_params(key, num_llm_layers, embedding_size, output_size,
                weight_dtype=jnp.float32):
    """Shapes matching StackedLayers(.., layer_depth=3, ..).

    Weights stored as (in, out) = transposed torch Linear weights (optionally
    bf16 for lower HBM traffic); biases stay f32 as (1, out) rows.
    """
    d0 = embedding_size * num_llm_layers
    h1 = embedding_size
    h2 = embedding_size // 2
    o = output_size
    ks = jax.random.split(key, 6)

    def linear(kw, kb, fan_in, fan_out):
        bound = 1.0 / jnp.sqrt(fan_in)
        w = jax.random.uniform(kw, (fan_in, fan_out), jnp.float32, -bound, bound)
        b = jax.random.uniform(kb, (1, fan_out), jnp.float32, -bound, bound)
        return w.astype(weight_dtype), b

    w1, b1 = linear(ks[0], ks[1], d0, h1)
    w2, b2 = linear(ks[2], ks[3], h1, h2)
    w3, b3 = linear(ks[4], ks[5], h2, o)
    return (w1, b1, w2, b2, w3, b3)


def reference_forward(x, params):
    """Pure-JAX reference mirroring the kernel's dtype handling."""
    w1, b1, w2, b2, w3, b3 = params
    cdt = w1.dtype
    h = x.reshape(x.shape[0], -1)
    h = jnp.maximum(
        jnp.dot(h.astype(cdt), w1, preferred_element_type=jnp.float32) + b1, 0.0)
    h = jnp.maximum(
        jnp.dot(h.astype(cdt), w2, preferred_element_type=jnp.float32) + b2, 0.0)
    return jnp.dot(h.astype(cdt), w3, preferred_element_type=jnp.float32) + b3


if __name__ == "__main__":
    key = jax.random.PRNGKey(0)
    k_x, k_p, k_x2, k_p2, k_x3 = jax.random.split(key, 5)

    num_llm_layers, embedding_size, output_size = 4, 32, 8
    params = init_params(k_p, num_llm_layers, embedding_size, output_size)

    # Tolerances are modest because XLA's reference matmul and the Mosaic MXU
    # lowering may use different f32 pass counts; real bugs show up as O(1).
    F32_TOL = 2e-2
    BF16_TOL = 7e-2

    # 1) tiny batch, f32 weights (single whole-batch tile) --------------------
    x = jax.random.normal(k_x, (2, num_llm_layers, embedding_size), jnp.float32)
    out, aux = stacked_layers_forward(x, params)
    out = jax.block_until_ready(out)
    assert aux is None and out.shape == (2, output_size)
    assert jnp.allclose(out, reference_forward(x, params),
                        atol=F32_TOL, rtol=F32_TOL), "f32 mismatch vs reference"

    # 2) multi batch-tile path with ragged last tile (600 = 256 + 256 + 88) ---
    x2 = jax.random.normal(k_x2, (600, num_llm_layers, embedding_size), jnp.float32)
    out2, _ = stacked_layers_forward(x2, params, batch_tile=256)
    out2 = jax.block_until_ready(out2)
    assert out2.shape == (600, output_size)
    assert jnp.allclose(out2, reference_forward(x2, params),
                        atol=F32_TOL, rtol=F32_TOL), "tiled mismatch vs reference"

    # 3) bf16 weights (halves weight HBM traffic), f32 MXU accumulation -------
    params_bf16 = init_params(k_p, num_llm_layers, embedding_size, output_size,
                              weight_dtype=jnp.bfloat16)
    out3, _ = stacked_layers_forward(x2, params_bf16, batch_tile=256)
    out3 = jax.block_until_ready(out3)
    assert jnp.allclose(out3, reference_forward(x2, params_bf16),
                        atol=BF16_TOL, rtol=BF16_TOL), "bf16-weight mismatch"

    # 4) bf16 activations accepted at the boundary (no forced f32 upcast) -----
    x2_bf16 = x2.astype(jnp.bfloat16)
    out4, _ = stacked_layers_forward(x2_bf16, params, batch_tile=256)
    out4 = jax.block_until_ready(out4)
    assert jnp.allclose(out4, reference_forward(x2_bf16, params),
                        atol=BF16_TOL, rtol=BF16_TOL), "bf16-activation mismatch"

    # 5) K-tiled layer 1 (d0 = 256 split into two 128-wide K blocks) ----------
    params_k = init_params(k_p2, num_llm_layers, 64, output_size)
    x3 = jax.random.normal(k_x3, (100, num_llm_layers, 64), jnp.float32)
    out5, _ = stacked_layers_forward(x3, params_k, k_tile=128)
    out5 = jax.block_until_ready(out5)
    assert out5.shape == (100, output_size)
    assert jnp.allclose(out5, reference_forward(x3, params_k),
                        atol=F32_TOL, rtol=F32_TOL), "K-tiled mismatch"

    print("KERNEL_OK")
</pallas_src>

<mosaic_0001>
module attributes {stable_mosaic.version = 11 : i64} {
  func.func @_mlp_kernel(%arg0: i32, %arg1: i32, %arg2: memref<2x128xf32, #tpu.memory_space<vmem>>, %arg3: memref<128x32xf32, #tpu.memory_space<vmem>>, %arg4: memref<1x32xf32, #tpu.memory_space<vmem>>, %arg5: memref<32x16xf32, #tpu.memory_space<vmem>>, %arg6: memref<1x16xf32, #tpu.memory_space<vmem>>, %arg7: memref<16x128xf32, #tpu.memory_space<vmem>>, %arg8: memref<1x128xf32, #tpu.memory_space<vmem>>, %arg9: memref<2x8xf32, #tpu.memory_space<vmem>>, %arg10: memref<2x32xf32, #tpu.memory_space<vmem>>) attributes {dimension_semantics = [#tpu.dimension_semantics<parallel>, #tpu.dimension_semantics<arbitrary>], iteration_bounds = array<i64: 1, 1>, scalar_prefetch = 0 : i64, scratch_operands = 1 : i64, tpu.core_type = #tpu.core_type<tc>, window_params = [{transform_indices = @transform_0, window_bounds = array<i64: 2, 128>}, {transform_indices = @transform_1, window_bounds = array<i64: 128, 32>}, {pipeline_mode = #tpu.pipeline_mode<synchronous>, transform_indices = @transform_2, window_bounds = array<i64: 1, 32>}, {pipeline_mode = #tpu.pipeline_mode<synchronous>, transform_indices = @transform_3, window_bounds = array<i64: 32, 16>}, {pipeline_mode = #tpu.pipeline_mode<synchronous>, transform_indices = @transform_4, window_bounds = array<i64: 1, 16>}, {pipeline_mode = #tpu.pipeline_mode<synchronous>, transform_indices = @transform_5, window_bounds = array<i64: 16, 128>}, {pipeline_mode = #tpu.pipeline_mode<synchronous>, transform_indices = @transform_6, window_bounds = array<i64: 1, 128>}, {transform_indices = @transform_7, window_bounds = array<i64: 2, 8>}]} {
    %c0_i32 = arith.constant 0 : i32
    %0 = arith.cmpi eq, %arg1, %c0_i32 : i32
    %1 = arith.extui %0 : i1 to i32
    %c0_i32_0 = arith.constant 0 : i32
    %2 = arith.cmpi ne, %1, %c0_i32_0 : i32
    scf.if %2 {
      %cst_10 = arith.constant 0.000000e+00 : f32
      %12 = vector.broadcast %cst_10 : f32 to vector<2x32xf32>
      %c0_11 = arith.constant 0 : index
      %c0_12 = arith.constant 0 : index
      %13 = vector.load %arg10[%c0_11, %c0_12] : memref<2x32xf32, #tpu.memory_space<vmem>>, vector<2x32xf32>
      tpu.vector_store %arg10[%c0_11, %c0_12], %12 {strides = array<i32>} : memref<2x32xf32, #tpu.memory_space<vmem>>, vector<2x32xf32>,
    } else {
    }
    %c0 = arith.constant 0 : index
    %c0_1 = arith.constant 0 : index
    %3 = vector.load %arg10[%c0, %c0_1] : memref<2x32xf32, #tpu.memory_space<vmem>>, vector<2x32xf32>
    %c0_2 = arith.constant 0 : index
    %c0_3 = arith.constant 0 : index
    %4 = vector.load %arg2[%c0_2, %c0_3] : memref<2x128xf32, #tpu.memory_space<vmem>>, vector<2x128xf32>
    %c0_4 = arith.constant 0 : index
    %c0_5 = arith.constant 0 : index
    %5 = vector.load %arg3[%c0_4, %c0_5] : memref<128x32xf32, #tpu.memory_space<vmem>>, vector<128x32xf32>
    %cst = arith.constant dense<0.000000e+00> : vector<2x32xf32>
    %6 = tpu.matmul %4, %5, %cst {dimension_numbers = #tpu.dot_dimension_numbers<[1], [0], [0], [1], [0, 0, 1, 1], [], []>} : vector<2x128xf32>, vector<128x32xf32>, vector<2x32xf32> -> vector<2x32xf32>
    %7 = arith.addf %3, %6 : vector<2x32xf32>
    %c0_6 = arith.constant 0 : index
    %c0_7 = arith.constant 0 : index
    %8 = vector.load %arg10[%c0_6, %c0_7] : memref<2x32xf32, #tpu.memory_space<vmem>>, vector<2x32xf32>
    tpu.vector_store %arg10[%c0_6, %c0_7], %7 {strides = array<i32>} : memref<2x32xf32, #tpu.memory_space<vmem>>, vector<2x32xf32>,
    %c0_i32_8 = arith.constant 0 : i32
    %9 = arith.cmpi eq, %arg1, %c0_i32_8 : i32
    %10 = arith.extui %9 : i1 to i32
    %c0_i32_9 = arith.constant 0 : i32
    %11 = arith.cmpi ne, %10, %c0_i32_9 : i32
    scf.if %11 {
      %c0_10 = arith.constant 0 : index
      %c0_11 = arith.constant 0 : index
      %12 = vector.load %arg10[%c0_10, %c0_11] : memref<2x32xf32, #tpu.memory_space<vmem>>, vector<2x32xf32>
      %c0_12 = arith.constant 0 : index
      %c0_13 = arith.constant 0 : index
      %13 = vector.load %arg4[%c0_12, %c0_13] : memref<1x32xf32, #tpu.memory_space<vmem>>, vector<1x32xf32>
      %14 = vector.broadcast %13 : vector<1x32xf32> to vector<2x32xf32>
      %15 = arith.addf %12, %14 : vector<2x32xf32>
      %cst_14 = arith.constant 0.000000e+00 : f32
      %16 = vector.broadcast %cst_14 : f32 to vector<2x32xf32>
      %17 = arith.maximumf %15, %16 : vector<2x32xf32>
      %c0_15 = arith.constant 0 : index
      %c0_16 = arith.constant 0 : index
      %18 = vector.load %arg5[%c0_15, %c0_16] : memref<32x16xf32, #tpu.memory_space<vmem>>, vector<32x16xf32>
      %cst_17 = arith.constant dense<0.000000e+00> : vector<2x16xf32>
      %19 = tpu.matmul %17, %18, %cst_17 {dimension_numbers = #tpu.dot_dimension_numbers<[1], [0], [0], [1], [0, 0, 1, 1], [], []>} : vector<2x32xf32>, vector<32x16xf32>, vector<2x16xf32> -> vector<2x16xf32>
      %c0_18 = arith.constant 0 : index
      %c0_19 = arith.constant 0 : index
      %20 = vector.load %arg6[%c0_18, %c0_19] : memref<1x16xf32, #tpu.memory_space<vmem>>, vector<1x16xf32>
      %21 = vector.broadcast %20 : vector<1x16xf32> to vector<2x16xf32>
      %22 = arith.addf %19, %21 : vector<2x16xf32>
      %cst_20 = arith.constant 0.000000e+00 : f32
      %23 = vector.broadcast %cst_20 : f32 to vector<2x16xf32>
      %24 = arith.maximumf %22, %23 : vector<2x16xf32>
      %c0_21 = arith.constant 0 : index
      %c0_22 = arith.constant 0 : index
      %25 = vector.load %arg7[%c0_21, %c0_22] : memref<16x128xf32, #tpu.memory_space<vmem>>, vector<16x128xf32>
      %cst_23 = arith.constant dense<0.000000e+00> : vector<2x128xf32>
      %26 = tpu.matmul %24, %25, %cst_23 {dimension_numbers = #tpu.dot_dimension_numbers<[1], [0], [0], [1], [0, 0, 1, 1], [], []>} : vector<2x16xf32>, vector<16x128xf32>, vector<2x128xf32> -> vector<2x128xf32>
      %c0_24 = arith.constant 0 : index
      %c0_25 = arith.constant 0 : index
      %27 = vector.load %arg8[%c0_24, %c0_25] : memref<1x128xf32, #tpu.memory_space<vmem>>, vector<1x128xf32>
      %28 = vector.broadcast %27 : vector<1x128xf32> to vector<2x128xf32>
      %29 = arith.addf %26, %28 : vector<2x128xf32>
      %30 = vector.extract_strided_slice %29 {offsets = [0, 0], sizes = [2, 8], strides = [1, 1]} : vector<2x128xf32> to vector<2x8xf32>
      %c0_26 = arith.constant 0 : index
      %c0_27 = arith.constant 0 : index
      %31 = vector.load %arg9[%c0_26, %c0_27] : memref<2x8xf32, #tpu.memory_space<vmem>>, vector<2x8xf32>
      tpu.vector_store %arg9[%c0_26, %c0_27], %30 {strides = array<i32>} : memref<2x8xf32, #tpu.memory_space<vmem>>, vector<2x8xf32>,
    } else {
    }
    return
  }
  func.func @transform_0(%arg0: i32, %arg1: i32) -> (i32, i32) {
    %c0_i32 = arith.constant 0 : i32
    return %arg0, %arg1 : i32, i32
  }
  func.func @transform_1(%arg0: i32, %arg1: i32) -> (i32, i32) {
    %c0_i32 = arith.constant 0 : i32
    %c0_i32_0 = arith.constant 0 : i32
    return %arg1, %c0_i32 : i32, i32
  }
  func.func @transform_2(%arg0: i32, %arg1: i32) -> (i32, i32) {
    %c0_i32 = arith.constant 0 : i32
    %c0_i32_0 = arith.constant 0 : i32
    %c0_i32_1 = arith.constant 0 : i32
    return %c0_i32, %c0_i32_0 : i32, i32
  }
  func.func @transform_3(%arg0: i32, %arg1: i32) -> (i32, i32) {
    %c0_i32 = arith.constant 0 : i32
    %c0_i32_0 = arith.constant 0 : i32
    %c0_i32_1 = arith.constant 0 : i32
    return %c0_i32, %c0_i32_0 : i32, i32
  }
  func.func @transform_4(%arg0: i32, %arg1: i32) -> (i32, i32) {
    %c0_i32 = arith.constant 0 : i32
    %c0_i32_0 = arith.constant 0 : i32
    %c0_i32_1 = arith.constant 0 : i32
    return %c0_i32, %c0_i32_0 : i32, i32
  }
  func.func @transform_5(%arg0: i32, %arg1: i32) -> (i32, i32) {
    %c0_i32 = arith.constant 0 : i32
    %c0_i32_0 = arith.constant 0 : i32
    %c0_i32_1 = arith.constant 0 : i32
    return %c0_i32, %c0_i32_0 : i32, i32
  }
  func.func @transform_6(%arg0: i32, %arg1: i32) -> (i32, i32) {
    %c0_i32 = arith.constant 0 : i32
    %c0_i32_0 = arith.constant 0 : i32
    %c0_i32_1 = arith.constant 0 : i32
    return %c0_i32, %c0_i32_0 : i32, i32
  }
  func.func @transform_7(%arg0: i32, %arg1: i32) -> (i32, i32) {
    %c0_i32 = arith.constant 0 : i32
    %c0_i32_0 = arith.constant 0 : i32
    return %arg0, %c0_i32 : i32, i32
  }
}

</mosaic_0001>

<bundles_post_ra>
// kernel: stacked_layers_forward.1
= control target key start
LH: loop header
LB: loop body
LE: loop exit
PB: predicated region body
PF: predicated region fallthrough
CT: control target
= control target key end

     0   :  { %vm31_vm0 = vcmask 254976   ;;  %v466_v3 = vmov 0.0|0.0   ;;  %v467_v6 = vmov 0.0   ;;  %vm468_vm1 = vmmov 0   ;;  %s609_s0 = inlined_call_operand.vmem [shape: f32[2,128], index: 0, kind: input, shape index: {}]   ;;  %s610_s1 = inlined_call_operand.vmem [shape: f32[128,32], index: 1, kind: input, shape index: {}]   ;;  %s611_s2 = inlined_call_operand.vmem [shape: f32[1,32], index: 2, kind: input, shape index: {}]   ;;  %s612_s3 = inlined_call_operand.vmem [shape: f32[32,16], index: 3, kind: input, shape index: {}]   ;;  %s613_s4 = inlined_call_operand.vmem [shape: f32[1,16], index: 4, kind: input, shape index: {}]   ;;  %s614_s5 = inlined_call_operand.vmem [shape: f32[16,128], index: 5, kind: input, shape index: {}]   ;;  %s615_s6 = inlined_call_operand.vmem [shape: f32[1,128], index: 6, kind: input, shape index: {}]   ;;  %s616_s7 = inlined_call_operand.hbm [shape: f32[2,8], index: 7, kind: output, shape index: {}]  }
   0x1   :  { %v35_v0 = vld [vmem:[%s610_s1] sm:$0xff]  ;;  %v36_v1 = vld [vmem:[%s610_s1 + $0x8] sm:$0xff]  ;;  %v37_v2 = vld [vmem:[%s610_s1 + $0x10] sm:$0xff]  ;;  %405 = vmatprep.subr.bf16.mxu0 %v466_v3  ;;  %32 = vst.msk [vmem:[#allocation2] sm:$0x3] %vm31_vm0, %v467_v6  ;;  %429 = vmatprep.subr.bf16.mxu1 %v466_v3 }
   0x2   :  { %v406_v4 = vpack.c.bf16 %v36_v1, %v35_v0  ;;  %v38_v5 = vld [vmem:[%s610_s1 + $0x18] sm:$0xff]  ;;  %384 = vmatprep.mubr.msk.f32.mxu0 %vm468_vm1, %v467_v6  ;;  %395 = vmatprep.mubr.msk.f32.mxu1 %vm468_vm1, %v467_v6  ;;  %v39_v8 = vld [vmem:[%s610_s1 + $0x20] sm:$0xff]  ;;  %v40_v9 = vld [vmem:[%s610_s1 + $0x28] sm:$0xff] }
   0x3   :  { %v409_v7 = vpack.c.bf16 %v38_v5, %v37_v2 }
   0x4   :  { %407 = vmatpush3.bf16.msra.mxu0 %v406_v4 }
   0x5   :  { %408 = vmatprep.subr.bf16.mxu0 %v466_v3 }
   0x6   :  { %12 = vsyncpa [#allocation4], 0  ;;  %v412_v10 = vpack.c.bf16 %v40_v9, %v39_v8  ;;  %v41_v11 = vld [vmem:[%s610_s1 + $0x30] sm:$0xff]  ;;  %v42_v12 = vld [vmem:[%s610_s1 + $0x38] sm:$0xff]  ;;  %vm148_vm2 = vcmask 261120   ;;  %vm232_vm3 = vcmask 130048  }
   0x7   :  { %v415_v13 = vpack.c.bf16 %v42_v12, %v41_v11  ;;  %v43_v14 = vld [vmem:[%s610_s1 + $0x40] sm:$0xff]  ;;  %v44_v15 = vld [vmem:[%s610_s1 + $0x48] sm:$0xff]  ;;  %v45_v17 = vld [vmem:[%s610_s1 + $0x50] sm:$0xff]  ;;  %s469_s26 = smov [#allocation3]   ;;  %vm306_vm4 = vcmask 58368  }
   0x8   :  { %410 = vmatpush3.bf16.msra.mxu0 %v409_v7  ;;  %v418_v16 = vpack.c.bf16 %v44_v15, %v43_v14  ;;  %v46_v18 = vld [vmem:[%s610_s1 + $0x58] sm:$0xff]  ;;  %v47_v20 = vld [vmem:[%s610_s1 + $0x60] sm:$0xff]  ;;  %v48_v21 = vld [vmem:[%s610_s1 + $0x68] sm:$0xff]  ;;  %s314_s27 = sshll.u32 %s469_s26, 4  ;;  %s315_s27 = int_to_ptr.vmem [resolvable:$true] %s314_s27 }
   0x9   :  { %411 = vmatprep.subr.bf16.mxu0 %v466_v3  ;;  %v421_v19 = vpack.c.bf16 %v46_v18, %v45_v17  ;;  %v424_v22 = vpack.c.bf16 %v48_v21, %v47_v20  ;;  %v49_v23 = vld [vmem:[%s610_s1 + $0x70] sm:$0xff]  ;;  %v50_v24 = vld [vmem:[%s610_s1 + $0x78] sm:$0xff]  ;;  %v34_v26 = vld [vmem:[%s609_s0] sm:$0x3]  ;;  %p447_p1 = scmp.lt.s32.totalorder %s315_s27, %s315_s27 }
   0xa   :  { %v427_v25 = vpack.c.bf16 %v50_v24, %v49_v23  ;;  %v137_v27 = vld [vmem:[%s612_s3] sm:$0xff]  ;;  %v138_v28 = vld [vmem:[%s612_s3 + $0x8] sm:$0xff]  ;;  %v139_v29 = vld [vmem:[%s612_s3 + $0x10] sm:$0xff] }
   0xb   :  { %v430_v30 = vpack.c.bf16 %v138_v28, %v137_v27  ;;  %v140_v31 = vld [vmem:[%s612_s3 + $0x18] sm:$0xff]  ;;  %v33_v33 = vld [vmem:[#allocation2] sm:$0x3]  ;;  %v224_v42 = vld [vmem:[%s614_s5 + $0x8] sm:$0xff] }
   0xc   :  { %413 = vmatpush3.bf16.msra.mxu0 %v412_v10  ;;  %v433_v32 = vpack.c.bf16 %v140_v31, %v139_v29  ;;  %v322_v37 = vld [vmem:[%s611_s2] ss:$0 sm:$0xff] }
   0xd   :  { %414 = vmatprep.subr.bf16.mxu0 %v466_v3  ;;  %431 = vmatpush3.bf16.msra.mxu1 %v430_v30  ;;  %v223_v41 = vld [vmem:[%s614_s5] sm:$0xff]  ;;  %s442_s5 = scalar_lea.vmem %s315_s27, 32 }
   0xe   :  { %432 = vmatprep.subr.bf16.mxu1 %v466_v3  ;;  %v436_v43 = vpack.c.bf16 %v224_v42, %v223_v41  ;;  %v323_v44 = vld [vmem:[%s613_s4] ss:$0 sm:$0xff]  ;;  %p443_p0 = scmp.ne.s32.totalorder %s315_s27, %s442_s5  ;;  %p448_p2 = scmp.lt.s32.totalorder %s442_s5, %s442_s5 }
   0xf   :  { %v325_v49 = vld [vmem:[%s615_s6] ss:$0 sm:$0xff] }
  0x10   :  { %416 = vmatpush3.bf16.msra.mxu0 %v415_v13  ;;  %p449_p3 = por %p448_p2, %p447_p1 }
  0x11   :  { %417 = vmatprep.subr.bf16.mxu0 %v466_v3  ;;  %434 = vmatpush3.bf16.msra.mxu1 %v433_v32 }
  0x12   :  { %435 = vmatprep.subr.bf16.mxu1 %v466_v3  ;;  %p450_p4 = pnand %p449_p3, %p443_p0 }
  0x14   :  { %419 = vmatpush3.bf16.msra.mxu0 %v418_v16 }
  0x15   :  { %420 = vmatprep.subr.bf16.mxu0 %v466_v3 }
  0x18   :  { %422 = vmatpush3.bf16.msra.mxu0 %v421_v19 }
  0x19   :  { %423 = vmatprep.subr.bf16.mxu0 %v466_v3 }
  0x1c   :  { %425 = vmatpush3.bf16.msra.mxu0 %v424_v22 }
  0x1d   :  { %426 = vmatprep.subr.bf16.mxu0 %v466_v3 }
  0x20   :  { %428 = vmatpush3.bf16.msra.mxu0 %v427_v25 }
  0x23   :  { %385 = vmatmul.mubr.f32.vlgmr.msra.gmra.mrb[0].mxu0 %v34_v26 }
  0xf6   :  { %v117_v34 = vpop.f32.mrb[0].mxu0 }
  0xf7   :  { %v121_v35 = vadd.f32 %v117_v34, %v33_v33  ;;  %v386_v36 = vpop.f32.mrb[1].mxu0 }
  0xf9   :  { %123 = vst.msk [vmem:[#allocation2] sm:$0x3] %vm31_vm0, %v121_v35 }
 0x100   :  { %v127_v38 = vld [vmem:[#allocation2] sm:$0x3] }
 0x101   :  { %v135_v39 = vadd.f32 %v322_v37, %v127_v38 }
 0x103   :  { %v136_v40 = vmax.f32 %v135_v39, 0.0 }
 0x105   :  { %396 = vmatmul.mubr.msk.f32.vlgmr.msra.gmra.mrb[0].mxu1 %vm148_vm2, %v136_v40 }
 0x106   :  { %402 = vmatprep.mubr.msk.f32.mxu1 %vm468_vm1, %v467_v6  ;;  %437 = vmatpush3.bf16.msra.mxu1 %v436_v43 }
 0x1d8   :  { %v218_v45 = vpop.f32.mrb[0].mxu1 }
 0x1d9   :  { %v219_v46 = vadd.f32 %v323_v44, %v218_v45  ;;  %v397_v47 = vpop.f32.mrb[1].mxu1 }
 0x1db   :  { %v222_v48 = vmax.f32 %v219_v46, 0.0 }
 0x1dd   :  { %403 = vmatmul.mubr.msk.f32.vlgmr.msra.gmra.mrb[2].mxu1 %vm232_vm3, %v222_v48 }
 0x2b0   :  { %v302_v50 = vpop.f32.mrb[2].mxu1 }
 0x2b1   :  { %v303_v51 = vadd.f32 %v325_v49, %v302_v50  ;;  %v404_v52 = vpop.f32.mrb[3].mxu1 }
 0x2b3   :  { %307 = vst.msk [vmem:[#allocation3] sm:$0x3] %vm306_vm4, %v303_v51 }
 0x2b4   :  { %453 = shalt.err (!%p450_p4)
}
 0x2b5   :  { %s454_s29 = scalar_lea.hbm %s616_s7, 32 }
 0x2b6   :  { %p455_p5 = scmp.ne.s32.totalorder %s616_s7, %s454_s29  ;;  %p458_p6 = scmp.lt.u32.totalorder %s454_s29, %s616_s7 }
 0x2b8   :  { %p460_p7 = pnand %p458_p6, %p455_p5 }
 0x2ba   :  { %463 = shalt.err (!%p460_p7)
}
 0x2bb   :  { %317 = dma.vmem_to_hbm [thread:$0]  %s315_s27, 32, %s616_s7, [#allocation4]  }
 0x2bc   :  { %464 = dma.done.wait [#allocation4], 32  }
 0x2bd   :  { %465 = vsyncadd [#allocation4], 4294967264 }
 0x2be   :  { %321 = vsyncpa [#allocation4], 1 }

</bundles_post_ra>
